<compile_context>
chip_gen: v7x
topology: tpu7x:2x2x1
jax: 0.10.0
libtpu: 0.0.40
codegen_flags: <defaults>
</compile_context>

<pallas_src>
import functools

import jax
import jax.numpy as jnp
from jax import lax
from jax.experimental import pallas as pl
from jax.experimental.pallas import tpu as pltpu


def _round_up(x, m):
    return (x + m - 1) // m * m


def _pick_tile(n, target):
    """Largest tile <= target that is a multiple of 128 and divides n."""
    if n % 128 != 0:
        return n  # (not hit: wrapper pads N to a multiple of 128)
    t = min(_round_up(target, 128), n)
    while n % t != 0:
        t -= 128
    return t


def _supports_bf16_eup():
    """bf16 exp/VPU exist on v6e and later; not on v2-v5."""
    try:
        kind = jax.devices()[0].device_kind.lower()
    except Exception:  # pragma: no cover - backend introspection failure
        return False
    for old in ("v2", "v3", "v4", "v5"):
        if old in kind:
            return False
    return ("v6" in kind) or ("v7" in kind)


def _pam_kernel(x_q_ref, k_ref, v_ref, wq_ref, gamma_ref, o_ref,
                m_sc, l_sc, acc_sc, q_sc, *,
                n_real, tkv, mask_keys, use_bf16_probs):
    # x_q_ref:   (C, tq)        query tile of x (residual + Q-projection source)
    # k_ref:     (cq_pad, tkv)  pre-projected keys, bf16
    # v_ref:     (C, tkv)       pre-projected values, bf16
    # wq_ref:    (cq_pad, C)    zero-padded query projection, bf16
    # gamma_ref: (1,)           scalar in SMEM
    # o_ref:     (C, tq)
    # scratch:   m_sc/l_sc (1, tq) f32, acc_sc (C, tq) f32, q_sc (cq_pad, tq) bf16
    ki = pl.program_id(2)

    @pl.when(ki == 0)
    def _():
        m_sc[...] = jnp.full_like(m_sc, -jnp.inf)
        l_sc[...] = jnp.zeros_like(l_sc)
        acc_sc[...] = jnp.zeros_like(acc_sc)
        # Q projection once per query tile (invariant across the kv axis).
        x_q_b = x_q_ref[...].astype(jnp.bfloat16)                 # (C, tq)
        q_sc[...] = jnp.dot(wq_ref[...], x_q_b,
                            preferred_element_type=jnp.float32
                            ).astype(jnp.bfloat16)                # (cq_pad, tq)

    k_b = k_ref[...]                                              # (cq_pad, tkv)
    v_b = v_ref[...]                                              # (C, tkv)
    q_b = q_sc[...]                                               # (cq_pad, tq)

    # energy[m, n] = <k_m, q_n>; softmax runs over m (sublane axis) so the
    # accumulator stays in (C, tq) layout -> no transposes, lane-dense stores.
    energy = lax.dot_general(
        k_b, q_b, dimension_numbers=(((0,), (0,)), ((), ())),
        preferred_element_type=jnp.float32)                       # (tkv, tq)

    if mask_keys:
        # Padded key columns (global index >= n_real) must not contribute to
        # the softmax: push their energy to -1e30 so exp underflows to 0.
        key_idx = ki * tkv + lax.broadcasted_iota(jnp.int32, (tkv, 1), 0)
        energy = jnp.where(key_idx < n_real, energy, jnp.float32(-1e30))

    m_prev = m_sc[...]                                            # (1, tq)
    m_new = jnp.maximum(m_prev, jnp.max(energy, axis=0, keepdims=True))
    alpha = jnp.exp(m_prev - m_new)                               # (1, tq) f32

    if use_bf16_probs:
        # v6e/v7x: bf16 EUP exp; denominator accumulated in f32.
        p = jnp.exp((energy - m_new).astype(jnp.bfloat16))        # (tkv, tq) bf16
        l_sc[...] = alpha * l_sc[...] + jnp.sum(
            p, axis=0, keepdims=True, dtype=jnp.float32)
        p_mm = p
    else:
        # v5e (no bf16 EUP/VPU): keep exp/sum in f32, cast only for the MXU.
        p = jnp.exp(energy - m_new)                               # (tkv, tq) f32
        l_sc[...] = alpha * l_sc[...] + jnp.sum(p, axis=0, keepdims=True)
        p_mm = p.astype(jnp.bfloat16)

    # acc[c, n] += sum_m v[c, m] * p[m, n]  (normalization deferred)
    acc_sc[...] = alpha * acc_sc[...] + jnp.dot(
        v_b, p_mm, preferred_element_type=jnp.float32)
    m_sc[...] = m_new

    @pl.when(ki == pl.num_programs(2) - 1)
    def _():
        gamma = gamma_ref[0]
        inv_l = pl.reciprocal(l_sc[...], approx=True)             # (1, tq), EUP
        out = acc_sc[...] * inv_l                                 # (C, tq)
        o_ref[...] = (gamma * out
                      + x_q_ref[...].astype(jnp.float32)).astype(o_ref.dtype)


def pam_forward(x_nchw, wq, wk, wv, gamma, *, tq=256, tkv=1024,
                use_bf16_probs=None):
    """PAM forward.

    x_nchw: (B, C, H, W)
    wq, wk: (Cq, C)   (1x1 conv weights, squeezed; Cq = C // 8)
    wv:     (C, C)
    gamma:  scalar
    returns (B, C, H, W)
    """
    b, c, h, w = x_nchw.shape
    n = h * w
    cq = wq.shape[0]
    cq_pad = _round_up(max(cq, 1), 16)      # 16: bf16 sublane packing

    # Pad N to a multiple of 128 so tiles stay lane-aligned and VMEM bounded
    # for any feature-map size; padded key columns are masked in-kernel.
    n_pad = _round_up(n, 128)
    mask_keys = (n_pad != n)
    tq = _pick_tile(n_pad, tq)
    tkv = _pick_tile(n_pad, tkv)

    if use_bf16_probs is None:
        use_bf16_probs = _supports_bf16_eup()

    x_cn = x_nchw.reshape(b, c, n)          # free reshape, no transpose
    if mask_keys:
        x_cn = jnp.pad(x_cn, ((0, 0), (0, 0), (0, n_pad - n)))

    # --- Hoisted K/V projection: one fused bf16 matmul per forward. ---------
    pad_rows = ((0, cq_pad - cq), (0, 0))
    wq_p = jnp.pad(wq, pad_rows).astype(jnp.bfloat16)               # (cq_pad, C)
    wk_p = jnp.pad(wk, pad_rows).astype(jnp.bfloat16)               # (cq_pad, C)
    w_kv = jnp.concatenate([wk_p, wv.astype(jnp.bfloat16)], axis=0)  # (cq_pad+C, C)
    x_bf = x_cn.astype(jnp.bfloat16)
    kv = jnp.einsum('oc,bcn->bon', w_kv, x_bf,
                    preferred_element_type=jnp.float32).astype(jnp.bfloat16)
    k_all = kv[:, :cq_pad, :]                                        # (B, cq_pad, N_pad)
    v_all = kv[:, cq_pad:, :]                                        # (B, C, N_pad)

    gamma_arr = jnp.reshape(gamma, (1,)).astype(jnp.float32)

    kernel = functools.partial(_pam_kernel, n_real=n, tkv=tkv,
                               mask_keys=mask_keys,
                               use_bf16_probs=use_bf16_probs)

    # Advisory cost estimate (documents the roofline; lets XLA schedule the
    # wrapper-side projection around the long-running custom call).
    elt = jnp.dtype(x_nchw.dtype).itemsize
    flops = int(2 * b * n_pad * n_pad * (cq_pad + c)      # energy + PV matmuls
                + 2 * b * n_pad * cq_pad * c)             # in-kernel Q projection
    transcendentals = int(b * n_pad * n_pad + b * n_pad)  # exp + reciprocal
    bytes_accessed = int(
        b * c * n_pad * elt                               # x (residual + Q source)
        + b * c * n_pad * elt                             # output
        + b * (n_pad // tq) * (cq_pad + c) * n_pad * 2    # K/V streamed per q-tile
        + cq_pad * c * 2)                                 # Wq

    out_cn = pl.pallas_call(
        kernel,
        out_shape=jax.ShapeDtypeStruct((b, c, n_pad), x_nchw.dtype),
        grid_spec=pltpu.PrefetchScalarGridSpec(
            num_scalar_prefetch=0,
            grid=(b, n_pad // tq, n_pad // tkv),
            in_specs=[
                pl.BlockSpec((None, c, tq), lambda bi, qi, ki: (bi, 0, qi)),
                pl.BlockSpec((None, cq_pad, tkv), lambda bi, qi, ki: (bi, 0, ki)),
                pl.BlockSpec((None, c, tkv), lambda bi, qi, ki: (bi, 0, ki)),
                pl.BlockSpec((cq_pad, c), lambda bi, qi, ki: (0, 0)),
                pl.BlockSpec(memory_space=pltpu.MemorySpace.SMEM),
            ],
            out_specs=pl.BlockSpec((None, c, tq), lambda bi, qi, ki: (bi, 0, qi)),
            scratch_shapes=[
                pltpu.VMEM((1, tq), jnp.float32),        # running max
                pltpu.VMEM((1, tq), jnp.float32),        # running denominator
                pltpu.VMEM((c, tq), jnp.float32),        # un-normalized PV acc
                pltpu.VMEM((cq_pad, tq), jnp.bfloat16),  # cached Q tile
            ],
        ),
        compiler_params=pltpu.CompilerParams(
            dimension_semantics=("parallel", "parallel", "arbitrary"),
            vmem_limit_bytes=48 * 1024 * 1024),
        cost_estimate=pl.CostEstimate(flops=flops,
                                      transcendentals=transcendentals,
                                      bytes_accessed=bytes_accessed),
    )(x_cn, k_all, v_all, wq_p, gamma_arr)

    if mask_keys:
        out_cn = out_cn[:, :, :n]
    return out_cn.reshape(b, c, h, w)


def pam_reference(x_nchw, wq, wk, wv, gamma):
    """Pure-JAX reference mirroring the PyTorch module exactly (f32)."""
    b, c, h, w = x_nchw.shape
    n = h * w
    x_flat = x_nchw.reshape(b, c, n)                       # (B, C, N)
    proj_q = jnp.einsum('oc,bcn->bon', wq, x_flat)         # (B, Cq, N)
    proj_k = jnp.einsum('oc,bcn->bon', wk, x_flat)         # (B, Cq, N)
    proj_v = jnp.einsum('oc,bcn->bon', wv, x_flat)         # (B, C, N)
    energy = jnp.einsum('bcn,bcm->bnm', proj_q, proj_k)    # (B, N, N)
    att = jax.nn.softmax(energy, axis=-1)
    out = jnp.einsum('bcm,bnm->bcn', proj_v, att)          # (B, C, N)
    out = out.reshape(b, c, h, w)
    return gamma * out + x_nchw


if __name__ == "__main__":
    # Small shapes consistent with the module: in_plane divisible by 8.
    B, C, H, W = 2, 32, 16, 16
    Cq = C // 8

    key = jax.random.PRNGKey(0)
    kx, kq, kk, kvw = jax.random.split(key, 4)

    x = jax.random.normal(kx, (B, C, H, W), dtype=jnp.float32)
    wq = jax.random.normal(kq, (Cq, C), dtype=jnp.float32) * 0.1
    wk = jax.random.normal(kk, (Cq, C), dtype=jnp.float32) * 0.1
    wv = jax.random.normal(kvw, (C, C), dtype=jnp.float32) * 0.1
    # nn.Parameter(torch.zeros(1)) initializes gamma to 0 (output == x);
    # use a non-zero value so the attention path is actually exercised.
    gamma = jnp.float32(0.5)

    # Test 1: N = 256 (multiple of 128). Small tiles so the multi-kv-step
    # online-softmax path is exercised (grid (B, 2, 2)).
    fwd = jax.jit(functools.partial(pam_forward, tq=128, tkv=128))
    out = jax.block_until_ready(fwd(x, wq, wk, wv, gamma))
    ref = pam_reference(x, wq, wk, wv, gamma)
    assert out.shape == (B, C, H, W)
    err1 = float(jnp.max(jnp.abs(out - ref)))
    # bf16 MXU operands (+ bf16 probs on v6e/v7x) + approx reciprocal.
    assert jnp.allclose(out, ref, atol=5e-2, rtol=5e-2), err1

    # Test 2: N = 144 (NOT a multiple of 128) exercises the pad-to-128 +
    # key-masking path, still with multiple kv steps.
    H2, W2 = 12, 12
    x2 = jax.random.normal(kx, (B, C, H2, W2), dtype=jnp.float32)
    fwd2 = jax.jit(functools.partial(pam_forward, tq=128, tkv=128))
    out2 = jax.block_until_ready(fwd2(x2, wq, wk, wv, gamma))
    ref2 = pam_reference(x2, wq, wk, wv, gamma)
    assert out2.shape == (B, C, H2, W2)
    err2 = float(jnp.max(jnp.abs(out2 - ref2)))
    assert jnp.allclose(out2, ref2, atol=5e-2, rtol=5e-2), err2

    print("KERNEL_OK")
</pallas_src>

<mosaic_0001>
module attributes {stable_mosaic.version = 11 : i64} {
  func.func @_pam_kernel(%arg0: i32, %arg1: i32, %arg2: i32, %arg3: memref<1x32x128xf32, #tpu.memory_space<vmem>>, %arg4: memref<1x16x128xbf16, #tpu.memory_space<vmem>>, %arg5: memref<1x32x128xbf16, #tpu.memory_space<vmem>>, %arg6: memref<16x32xbf16, #tpu.memory_space<vmem>>, %arg7: memref<1xf32, #tpu.memory_space<smem>>, %arg8: memref<1x32x128xf32, #tpu.memory_space<vmem>>, %arg9: memref<1x128xf32, #tpu.memory_space<vmem>>, %arg10: memref<1x128xf32, #tpu.memory_space<vmem>>, %arg11: memref<32x128xf32, #tpu.memory_space<vmem>>, %arg12: memref<16x128xbf16, #tpu.memory_space<vmem>>) attributes {dimension_semantics = [#tpu.dimension_semantics<parallel>, #tpu.dimension_semantics<parallel>, #tpu.dimension_semantics<arbitrary>], iteration_bounds = array<i64: 2, 2, 2>, scalar_prefetch = 0 : i64, scratch_operands = 4 : i64, tpu.core_type = #tpu.core_type<tc>, window_params = [{transform_indices = @transform_0, window_bounds = array<i64: 1, 32, 128>}, {transform_indices = @transform_1, window_bounds = array<i64: 1, 16, 128>}, {transform_indices = @transform_2, window_bounds = array<i64: 1, 32, 128>}, {pipeline_mode = #tpu.pipeline_mode<synchronous>, transform_indices = @transform_3, window_bounds = array<i64: 16, 32>}, {transform_indices = @transform_4, window_bounds = array<i64: 1>}, {transform_indices = @transform_5, window_bounds = array<i64: 1, 32, 128>}]} {
    %c0_i32 = arith.constant 0 : i32
    %0 = arith.cmpi eq, %arg2, %c0_i32 : i32
    %1 = arith.extui %0 : i1 to i32
    %c0_i32_0 = arith.constant 0 : i32
    %2 = arith.cmpi ne, %1, %c0_i32_0 : i32
    scf.if %2 {
      %cst_24 = arith.constant 0xFF800000 : f32
      %35 = vector.broadcast %cst_24 : f32 to vector<1x128xf32>
      %c0_25 = arith.constant 0 : index
      %c0_26 = arith.constant 0 : index
      %36 = vector.load %arg9[%c0_25, %c0_26] : memref<1x128xf32, #tpu.memory_space<vmem>>, vector<1x128xf32>
      tpu.vector_store %arg9[%c0_25, %c0_26], %35 {strides = array<i32>} : memref<1x128xf32, #tpu.memory_space<vmem>>, vector<1x128xf32>,
      %cst_27 = arith.constant 0.000000e+00 : f32
      %37 = vector.broadcast %cst_27 : f32 to vector<1x128xf32>
      %c0_28 = arith.constant 0 : index
      %c0_29 = arith.constant 0 : index
      %38 = vector.load %arg10[%c0_28, %c0_29] : memref<1x128xf32, #tpu.memory_space<vmem>>, vector<1x128xf32>
      tpu.vector_store %arg10[%c0_28, %c0_29], %37 {strides = array<i32>} : memref<1x128xf32, #tpu.memory_space<vmem>>, vector<1x128xf32>,
      %cst_30 = arith.constant 0.000000e+00 : f32
      %39 = vector.broadcast %cst_30 : f32 to vector<32x128xf32>
      %c0_31 = arith.constant 0 : index
      %c0_32 = arith.constant 0 : index
      %40 = vector.load %arg11[%c0_31, %c0_32] : memref<32x128xf32, #tpu.memory_space<vmem>>, vector<32x128xf32>
      tpu.vector_store %arg11[%c0_31, %c0_32], %39 {strides = array<i32>} : memref<32x128xf32, #tpu.memory_space<vmem>>, vector<32x128xf32>,
      %c0_33 = arith.constant 0 : index
      %c0_34 = arith.constant 0 : index
      %c0_35 = arith.constant 0 : index
      %41 = vector.load %arg3[%c0_33, %c0_34, %c0_35] : memref<1x32x128xf32, #tpu.memory_space<vmem>>, vector<1x32x128xf32>
      %42 = vector.shape_cast %41 : vector<1x32x128xf32> to vector<32x128xf32>
      %43 = arith.truncf %42 : vector<32x128xf32> to vector<32x128xbf16>
      %c0_36 = arith.constant 0 : index
      %c0_37 = arith.constant 0 : index
      %44 = vector.load %arg6[%c0_36, %c0_37] : memref<16x32xbf16, #tpu.memory_space<vmem>>, vector<16x32xbf16>
      %cst_38 = arith.constant dense<0.000000e+00> : vector<16x128xf32>
      %45 = tpu.matmul %44, %43, %cst_38 {dimension_numbers = #tpu.dot_dimension_numbers<[1], [0], [0], [1], [0, 0, 1, 1], [], []>} : vector<16x32xbf16>, vector<32x128xbf16>, vector<16x128xf32> -> vector<16x128xf32>
      %46 = arith.truncf %45 : vector<16x128xf32> to vector<16x128xbf16>
      %c0_39 = arith.constant 0 : index
      %c0_40 = arith.constant 0 : index
      %47 = vector.load %arg12[%c0_39, %c0_40] : memref<16x128xbf16, #tpu.memory_space<vmem>>, vector<16x128xbf16>
      tpu.vector_store %arg12[%c0_39, %c0_40], %46 {strides = array<i32>} : memref<16x128xbf16, #tpu.memory_space<vmem>>, vector<16x128xbf16>,
    } else {
    }
    %c0 = arith.constant 0 : index
    %c0_1 = arith.constant 0 : index
    %c0_2 = arith.constant 0 : index
    %3 = vector.load %arg4[%c0, %c0_1, %c0_2] : memref<1x16x128xbf16, #tpu.memory_space<vmem>>, vector<1x16x128xbf16>
    %4 = vector.shape_cast %3 : vector<1x16x128xbf16> to vector<16x128xbf16>
    %c0_3 = arith.constant 0 : index
    %c0_4 = arith.constant 0 : index
    %c0_5 = arith.constant 0 : index
    %5 = vector.load %arg5[%c0_3, %c0_4, %c0_5] : memref<1x32x128xbf16, #tpu.memory_space<vmem>>, vector<1x32x128xbf16>
    %6 = vector.shape_cast %5 : vector<1x32x128xbf16> to vector<32x128xbf16>
    %c0_6 = arith.constant 0 : index
    %c0_7 = arith.constant 0 : index
    %7 = vector.load %arg12[%c0_6, %c0_7] : memref<16x128xbf16, #tpu.memory_space<vmem>>, vector<16x128xbf16>
    %cst = arith.constant dense<0.000000e+00> : vector<128x128xf32>
    %8 = tpu.matmul %4, %7, %cst {dimension_numbers = #tpu.dot_dimension_numbers<[0], [0], [1], [1], [0, 1, 1, 1], [], []>} : vector<16x128xbf16>, vector<16x128xbf16>, vector<128x128xf32> -> vector<128x128xf32>
    %c0_8 = arith.constant 0 : index
    %c0_9 = arith.constant 0 : index
    %9 = vector.load %arg9[%c0_8, %c0_9] : memref<1x128xf32, #tpu.memory_space<vmem>>, vector<1x128xf32>
    %cst_10 = arith.constant dense<0xFF800000> : vector<128xf32>
    %10 = vector.multi_reduction <maximumf>, %8, %cst_10 [0] : vector<128x128xf32> to vector<128xf32>
    %11 = vector.shape_cast %10 : vector<128xf32> to vector<1x128xf32>
    %12 = arith.maximumf %9, %11 : vector<1x128xf32>
    %13 = arith.subf %9, %12 : vector<1x128xf32>
    %14 = math.exp %13 : vector<1x128xf32>
    %15 = vector.broadcast %12 : vector<1x128xf32> to vector<128x128xf32>
    %16 = arith.subf %8, %15 : vector<128x128xf32>
    %17 = math.exp %16 : vector<128x128xf32>
    %c0_11 = arith.constant 0 : index
    %c0_12 = arith.constant 0 : index
    %18 = vector.load %arg10[%c0_11, %c0_12] : memref<1x128xf32, #tpu.memory_space<vmem>>, vector<1x128xf32>
    %19 = arith.mulf %14, %18 : vector<1x128xf32>
    %cst_13 = arith.constant dense<0.000000e+00> : vector<128xf32>
    %20 = vector.multi_reduction <add>, %17, %cst_13 [0] : vector<128x128xf32> to vector<128xf32>
    %21 = vector.shape_cast %20 : vector<128xf32> to vector<1x128xf32>
    %22 = arith.addf %19, %21 : vector<1x128xf32>
    %c0_14 = arith.constant 0 : index
    %c0_15 = arith.constant 0 : index
    %23 = vector.load %arg10[%c0_14, %c0_15] : memref<1x128xf32, #tpu.memory_space<vmem>>, vector<1x128xf32>
    tpu.vector_store %arg10[%c0_14, %c0_15], %22 {strides = array<i32>} : memref<1x128xf32, #tpu.memory_space<vmem>>, vector<1x128xf32>,
    %24 = arith.truncf %17 : vector<128x128xf32> to vector<128x128xbf16>
    %c0_16 = arith.constant 0 : index
    %c0_17 = arith.constant 0 : index
    %25 = vector.load %arg11[%c0_16, %c0_17] : memref<32x128xf32, #tpu.memory_space<vmem>>, vector<32x128xf32>
    %26 = vector.broadcast %14 : vector<1x128xf32> to vector<32x128xf32>
    %27 = arith.mulf %26, %25 : vector<32x128xf32>
    %cst_18 = arith.constant dense<0.000000e+00> : vector<32x128xf32>
    %28 = tpu.matmul %6, %24, %cst_18 {dimension_numbers = #tpu.dot_dimension_numbers<[1], [0], [0], [1], [0, 0, 1, 1], [], []>} : vector<32x128xbf16>, vector<128x128xbf16>, vector<32x128xf32> -> vector<32x128xf32>
    %29 = arith.addf %27, %28 : vector<32x128xf32>
    %c0_19 = arith.constant 0 : index
    %c0_20 = arith.constant 0 : index
    %30 = vector.load %arg11[%c0_19, %c0_20] : memref<32x128xf32, #tpu.memory_space<vmem>>, vector<32x128xf32>
    tpu.vector_store %arg11[%c0_19, %c0_20], %29 {strides = array<i32>} : memref<32x128xf32, #tpu.memory_space<vmem>>, vector<32x128xf32>,
    %c0_21 = arith.constant 0 : index
    %c0_22 = arith.constant 0 : index
    %31 = vector.load %arg9[%c0_21, %c0_22] : memref<1x128xf32, #tpu.memory_space<vmem>>, vector<1x128xf32>
    tpu.vector_store %arg9[%c0_21, %c0_22], %12 {strides = array<i32>} : memref<1x128xf32, #tpu.memory_space<vmem>>, vector<1x128xf32>,
    %c1_i32 = arith.constant 1 : i32
    %32 = arith.cmpi eq, %arg2, %c1_i32 : i32
    %33 = arith.extui %32 : i1 to i32
    %c0_i32_23 = arith.constant 0 : i32
    %34 = arith.cmpi ne, %33, %c0_i32_23 : i32
    scf.if %34 {
      %c0_24 = arith.constant 0 : index
      %35 = memref.load %arg7[%c0_24] : memref<1xf32, #tpu.memory_space<smem>>
      %c0_25 = arith.constant 0 : index
      %c0_26 = arith.constant 0 : index
      %36 = vector.load %arg10[%c0_25, %c0_26] : memref<1x128xf32, #tpu.memory_space<vmem>>, vector<1x128xf32>
      %37 = tpu.reciprocal %36 {approx = true} : vector<1x128xf32> -> vector<1x128xf32>
      %c0_27 = arith.constant 0 : index
      %c0_28 = arith.constant 0 : index
      %38 = vector.load %arg11[%c0_27, %c0_28] : memref<32x128xf32, #tpu.memory_space<vmem>>, vector<32x128xf32>
      %39 = vector.broadcast %37 : vector<1x128xf32> to vector<32x128xf32>
      %40 = arith.mulf %38, %39 : vector<32x128xf32>
      %41 = vector.broadcast %35 : f32 to vector<32x128xf32>
      %42 = arith.mulf %41, %40 : vector<32x128xf32>
      %c0_29 = arith.constant 0 : index
      %c0_30 = arith.constant 0 : index
      %c0_31 = arith.constant 0 : index
      %43 = vector.load %arg3[%c0_29, %c0_30, %c0_31] : memref<1x32x128xf32, #tpu.memory_space<vmem>>, vector<1x32x128xf32>
      %44 = vector.shape_cast %43 : vector<1x32x128xf32> to vector<32x128xf32>
      %45 = arith.addf %42, %44 : vector<32x128xf32>
      %c0_32 = arith.constant 0 : index
      %c0_33 = arith.constant 0 : index
      %c0_34 = arith.constant 0 : index
      %46 = vector.load %arg8[%c0_32, %c0_33, %c0_34] : memref<1x32x128xf32, #tpu.memory_space<vmem>>, vector<1x32x128xf32>
      %47 = vector.shape_cast %46 : vector<1x32x128xf32> to vector<32x128xf32>
      %48 = vector.shape_cast %45 : vector<32x128xf32> to vector<1x32x128xf32>
      tpu.vector_store %arg8[%c0_32, %c0_33, %c0_34], %48 {strides = array<i32>} : memref<1x32x128xf32, #tpu.memory_space<vmem>>, vector<1x32x128xf32>,
    } else {
    }
    return
  }
  func.func @transform_0(%arg0: i32, %arg1: i32, %arg2: i32) -> (i32, i32, i32) {
    %c0_i32 = arith.constant 0 : i32
    %c0_i32_0 = arith.constant 0 : i32
    return %arg0, %c0_i32, %arg1 : i32, i32, i32
  }
  func.func @transform_1(%arg0: i32, %arg1: i32, %arg2: i32) -> (i32, i32, i32) {
    %c0_i32 = arith.constant 0 : i32
    %c0_i32_0 = arith.constant 0 : i32
    return %arg0, %c0_i32, %arg2 : i32, i32, i32
  }
  func.func @transform_2(%arg0: i32, %arg1: i32, %arg2: i32) -> (i32, i32, i32) {
    %c0_i32 = arith.constant 0 : i32
    %c0_i32_0 = arith.constant 0 : i32
    return %arg0, %c0_i32, %arg2 : i32, i32, i32
  }
  func.func @transform_3(%arg0: i32, %arg1: i32, %arg2: i32) -> (i32, i32) {
    %c0_i32 = arith.constant 0 : i32
    %c0_i32_0 = arith.constant 0 : i32
    %c0_i32_1 = arith.constant 0 : i32
    return %c0_i32, %c0_i32_0 : i32, i32
  }
  func.func @transform_4(%arg0: i32, %arg1: i32, %arg2: i32) -> i32 {
    %c0_i32 = arith.constant 0 : i32
    %c0_i32_0 = arith.constant 0 : i32
    return %c0_i32 : i32
  }
  func.func @transform_5(%arg0: i32, %arg1: i32, %arg2: i32) -> (i32, i32, i32) {
    %c0_i32 = arith.constant 0 : i32
    %c0_i32_0 = arith.constant 0 : i32
    return %arg0, %c0_i32, %arg1 : i32, i32, i32
  }
}

</mosaic_0001>

<bundles_post_ra>
// kernel: pam_forward.1
= control target key start
LH: loop header
LB: loop body
LE: loop exit
PB: predicated region body
PF: predicated region fallthrough
CT: control target
= control target key end

     0   :  { %s1698_s0 = inlined_call_operand.vmem [shape: f32[2,32,256], index: 0, kind: input, shape index: {}]   ;;  %s1699_s1 = inlined_call_operand.vmem [shape: bf16[2,16,256], index: 1, kind: input, shape index: {}]   ;;  %s1700_s2 = inlined_call_operand.vmem [shape: bf16[2,32,256], index: 2, kind: input, shape index: {}]   ;;  %s1701_s3 = inlined_call_operand.vmem [shape: bf16[16,32], index: 3, kind: input, shape index: {}]   ;;  %s1702_s4 = inlined_call_operand.<no memory space> [shape: f32[1], index: 4, kind: input, shape index: {}]   ;;  %s1703_s5 = inlined_call_operand.vmem [shape: f32[2,32,256], index: 5, kind: output, shape index: {}]  }
   0x1   :  { %1707 = sst [smem:[#allocation14_spill]] %s1698_s0 }
   0x2   :  { %10 = sst [smem:[#allocation6]] %s1702_s4 }
   0x3   :  { %s1429_s20 = smov 0   ;;  %s1431_s21 = smov 0  }
   0x4   :  { %s1433_s22 = smov 0   ;;  %s1435_s23 = smov 0  }
   0x5   :  { %s1437_s24 = smov 0   ;;  %s1439_s25 = smov 0  }
   0x6   :  { %s1441_s26 = smov 0   ;;  %s1443_s27 = smov 0  }
   0x7   :  { %s1445_s28 = smov 0   ;;  %s1447_s29 = smov 0  }
   0x8   :  { %s1449_s4 = smov 0  }
   0x9 LB: > { %s28_s30 = sadd.s32 1, %s1379_s27  ;;  %s31_s6 = sadd.s32 1, %s1383_s28  ;;  %s1391_s4 = sphi %s1449_s4, %s16_s4   ;;  %s1387_s29 = sphi %s1447_s29, %s1727_s29   ;;  %s1383_s28 = sphi %s1445_s28, %s1726_s28   ;;  %s1379_s27 = sphi %s1443_s27, %s1725_s27   ;;  %s1375_s26 = sphi %s1441_s26, %s1724_s26   ;;  %s1371_s25 = sphi %s1439_s25, %s1723_s25   ;;  %s1367_s24 = sphi %s1437_s24, %s1722_s24   ;;  %s1363_s23 = sphi %s1435_s23, %s1721_s23   ;;  %s1359_s22 = sphi %s1433_s22, %s1720_s22   ;;  %s1355_s21 = sphi %s1431_s21, %s1719_s21   ;;  %s1351_s20 = sphi %s1429_s20, %s1718_s20  }
   0xa   : > { %p29_p0 = scmp.ge.s32.totalorder %s28_s30, 2  ;;  %p51_p1 = scmp.ne.s32.totalorder %s1363_s23, %s1359_s22 }
   0xb   : > { %p52_p2 = scmp.eq.s32.totalorder %s1391_s4, 0  ;;  %s35_s7 = sadd.s32 1, %s1387_s29 }
   0xc   : > { %s1729_s30 = smov (%p29_p0, %s28_s30), 0  ;;  %s1731_s6 = smov (!%p29_p0, %s31_s6), %s1383_s28 }
   0xd   : > { %1708 = sst [smem:[#allocation11_spill]] %s1729_s30  ;;  %p33_p3 = scmp.ge.s32.totalorder %s1731_s6, 2 }
   0xe   : > { %s1067_s8 = sadd.s32 4294967295, %s1391_s4   ;;  %p1497_p4 = por %p52_p2, %p51_p1 }
   0xf   : > { %s1733_s6 = smov (%p33_p3, %s1731_s6), 0  ;;  %s1735_s7 = smov (!%p33_p3, %s35_s7), %s1387_s29 }
  0x10   : > { %1710 = sst [smem:[#allocation12_spill]] %s1733_s6  ;;  %s68_s10 = ssub.s32 %s1379_s27, %s1729_s30 }
  0x11   : > { %p79_p5 = scmp.ne.s32.totalorder %s1355_s21, %s1351_s20  ;;  %p37_p6 = scmp.ge.s32.totalorder %s1735_s7, 2 }
  0x12   : > { %p181_p7 = scmp.eq.s32.totalorder %s1067_s8, 7  ;;  %s40_s11 = ssub.s32 %s1383_s28, %s1733_s6 }
  0x13   : > { %p1510_p8 = por %p79_p5, %p52_p2  ;;  %s1737_s7 = smov (%p37_p6, %s1735_s7), 0 }
  0x14   : > { %1712 = sst [smem:[#allocation13_spill]] %s1737_s7  ;;  %s44_s13 = sadd.s32 1, %s1363_s23 }
  0x15   : > { %p1520_p9 = por %p181_p7, %p51_p1  ;;  %s39_s15 = ssub.s32 %s1387_s29, %s1737_s7 }
  0x16   : > { %s72_s16 = sadd.s32 1, %s1355_s21  ;;  %s41_s17 = sor.u32 %s40_s11, %s39_s15 }
  0x17   : > { %s69_s18 = sor.u32 %s68_s10, %s39_s15  ;;  %p42_p10 = scmp.eq.s32.totalorder %s41_s17, 0 }
  0x18   : > { %p70_p11 = scmp.eq.s32.totalorder %s69_s18, 0  ;;  %p1070_p12 = scmp.ge.s32.totalorder %s1391_s4, 8 }
  0x19   : > { %s1528_s19 = scalar_select %p42_p10, %s1363_s23, %s44_s13  }
  0x1a   : > { %s1531_s8 = scalar_select %p70_p11, %s1355_s21, %s72_s16  }
  0x1b   : > { %209 = sbr.rel (%p1070_p12) target bundleno = 61 (0x3d), region = 24 }
  0x22   : > { %212 = sbr.rel (!%p1497_p4) target bundleno = 46 (0x2e), region = 28  ;;  %s214_s6 = sand.u32 (%p1497_p4), 1, %s1363_s23  }
  0x23   : > { %s1072_s7 = sshll.u32 (%p1497_p4), %s1387_s29, 3  ;;  %s1071_s30 = sshll.u32 (%p1497_p4), %s214_s6, 5 }
  0x24   : > { %s218_s11 = sadd.s32 (%p1497_p4), %s1383_s28, %s1072_s7  ;;  %s1714_s0 = sld [smem:[#allocation14_spill]] (%p1497_p4) }
  0x25   : > { %s1073_s10 = sshll.u32 (%p1497_p4), %s218_s11, 3  ;;  %s216_s16 = scalar_lea.vmem (%p1497_p4), [#allocation7], %s1071_s30 }
  0x2a   : > { %s220_s13 = scalar_lea.vmem %s1714_s0, %s1073_s10 }
  0x2b   : > { %v254_v0 = vld [vmem:[%s220_s13] sm:$0xff]  ;;  %v256_v1 = vld [vmem:[%s220_s13 + $0x10] sm:$0xff] }
  0x2c   : > { %v258_v2 = vld [vmem:[%s220_s13 + $0x20] sm:$0xff]  ;;  %255 = vst [vmem:[%s216_s16] sm:$0xff] %v254_v0  ;;  %257 = vst [vmem:[%s216_s16 + $0x8] sm:$0xff] %v256_v1  ;;  %v260_v3 = vld [vmem:[%s220_s13 + $0x30] sm:$0xff] }
  0x2d   : > { %259 = vst [vmem:[%s216_s16 + $0x10] sm:$0xff] %v258_v2  ;;  %261 = vst [vmem:[%s216_s16 + $0x18] sm:$0xff] %v260_v3 }
  0x2e PF: > { %267 = sbr.rel (!%p1510_p8) target bundleno = 53 (0x35), region = 66  ;;  %s269_s6 = sand.u32 (%p1510_p8), 1, %s1355_s21  }
  0x2f   : > { %s1075_s7 = sshll.u32 (%p1510_p8), %s1387_s29, 2  ;;  %s1074_s9 = sshll.u32 (%p1510_p8), %s269_s6, 3 }
  0x30   : > { %s273_s18 = sadd.s32 (%p1510_p8), %s1379_s27, %s1075_s7  ;;  %s271_s17 = scalar_lea.vmem (%p1510_p8), [#allocation8], %s1074_s9 }
  0x31   : > { %s1076_s11 = sshll.u32 (%p1510_p8), %s273_s18, 2 }
  0x32   : > { %s275_s30 = scalar_lea.vmem (%p1510_p8), %s1699_s1, %s1076_s11 }
  0x33   : > { %v291_v4 = vld [vmem:[%s275_s30] sm:$0xf] (%p1510_p8)  ;;  %v293_v5 = vld [vmem:[%s275_s30 + $0x8] sm:$0xf] (%p1510_p8) }
  0x34   : > { %292 = vst [vmem:[%s271_s17] sm:$0xf] (%p1510_p8), %v291_v4  ;;  %294 = vst [vmem:[%s271_s17 + $0x4] sm:$0xf] (%p1510_p8), %v293_v5 }
  0x35 PF: > { %321 = sbr.rel (!%p1510_p8) target bundleno = 61 (0x3d), region = 107  ;;  %s323_s13 = sand.u32 (%p1510_p8), 1, %s1355_s21  }
  0x36   : > { %s1078_s16 = sshll.u32 (%p1510_p8), %s1387_s29, 3  ;;  %s1077_s6 = sshll.u32 (%p1510_p8), %s323_s13, 4 }
  0x37   : > { %s327_s7 = sadd.s32 (%p1510_p8), %s1379_s27, %s1078_s16  ;;  %s325_s9 = scalar_lea.vmem (%p1510_p8), [#allocation9], %s1077_s6 }
  0x38   : > { %s1079_s18 = sshll.u32 (%p1510_p8), %s327_s7, 2 }
  0x39   : > { %s329_s11 = scalar_lea.vmem (%p1510_p8), %s1700_s2, %s1079_s18 }
  0x3a   : > { %v345_v6 = vld [vmem:[%s329_s11] sm:$0xf] (%p1510_p8)  ;;  %v347_v7 = vld [vmem:[%s329_s11 + $0x8] sm:$0xf] (%p1510_p8)  ;;  %v349_v8 = vld [vmem:[%s329_s11 + $0x10] sm:$0xf] (%p1510_p8) }
  0x3b   : > { %346 = vst [vmem:[%s325_s9] sm:$0xf] (%p1510_p8), %v345_v6  ;;  %348 = vst [vmem:[%s325_s9 + $0x4] sm:$0xf] (%p1510_p8), %v347_v7  ;;  %v351_v9 = vld [vmem:[%s329_s11 + $0x18] sm:$0xf] (%p1510_p8) }
  0x3c   : > { %350 = vst [vmem:[%s325_s9 + $0x8] sm:$0xf] %v349_v8  ;;  %352 = vst [vmem:[%s325_s9 + $0xc] sm:$0xf] %v351_v9 }
  0x3d PF: > { %p1080_p13 = scmp.ge.s32.totalorder %s1391_s4, 1  ;;  %p382_p0 = scmp.lt.s32.totalorder %s1391_s4, 9 }
  0x3f   : > { %p383_p1 = pnand %p1080_p13, %p382_p0 }
  0x40   : > { %s389_s0 = sand.u32 (!%p383_p1), 1, %s1359_s22   ;;  %s396_s12 = sand.u32 (!%p383_p1), 1, %s1351_s20  }
  0x41   : > { %386 = sbr.rel (%p383_p1) target bundleno = 960 (0x3c0), region = 148  ;;  %s1081_s15 = sshll.u32 (!%p383_p1), %s389_s0, 5 }
  0x42   : > { %s1562_s30 = sshll.u32 (!%p383_p1), %s396_s12, 3  ;;  %s1564_s17 = sshll.u32 (!%p383_p1), %s396_s12, 4 }
  0x43   : > { %s1566_s13 = scalar_lea.vmem (!%p383_p1), [#allocation7], %s1081_s15  ;;  %s398_s16 = scalar_lea.vmem (!%p383_p1), [#allocation8], %s1562_s30 }
  0x44   : > { %s405_s6 = scalar_lea.vmem (!%p383_p1), [#allocation9], %s1564_s17  ;;  %s1570_s7 = scalar_lea.vmem (!%p383_p1), [#allocation10], %s1081_s15 }
  0x45   : > { %p1085_p2 = scmp.ne.s32.totalorder (!%p383_p1), %s1367_s24, 0 }
  0x48   : > { %441 = sbr.rel (%p1085_p2) target bundleno = 299 (0x12b), region = 164  ;;  %v448_v10 = vld [vmem:[%s1566_s13] sm:$0xff] (!%p1085_p2)  ;;  %v449_v11 = vld [vmem:[%s1566_s13 + $0x8] sm:$0xff] (!%p1085_p2)  ;;  %v450_v12 = vld [vmem:[%s1566_s13 + $0x10] sm:$0xff] (!%p1085_p2)  ;;  %v1393_v13 = vmov (!%p1085_p2), -inf   ;;  %v1394_v14 = vmov (!%p1085_p2), 0.0  }
  0x49   : > { %442 = vst [vmem:[#allocation2] sm:$0x1] (!%p1085_p2), %v1393_v13  ;;  %443 = vst [vmem:[#allocation3] sm:$0x1] (!%p1085_p2), %v1394_v14  ;;  %1127 = vmatprep.subr.bf16.mxu0 (!%p1085_p2), %v1394_v14  ;;  %v452_v15 = vpack.c.bf16 (!%p1085_p2), %v449_v11, %v448_v10  ;;  %v451_v16 = vld [vmem:[%s1566_s13 + $0x18] sm:$0xff] (!%p1085_p2)  ;;  %vm1395_vm0 = vmmov (!%p1085_p2), 0  }
  0x4a   : > { %444 = vst [vmem:[#allocation4] sm:$0xff] (!%p1085_p2), %v1394_v14  ;;  %445 = vst [vmem:[#allocation4 + $0x8] sm:$0xff] (!%p1085_p2), %v1394_v14  ;;  %1131 = vmatprep.mubr.msk.bf16.mxu0 (!%p1085_p2), %vm1395_vm0, %v1394_v14  ;;  %v453_v17 = vpack.c.bf16 (!%p1085_p2), %v451_v16, %v450_v12  ;;  %v1265_v18 = vld [vmem:[%s1701_s3] sm:$0xff] (!%p1085_p2)   ;;  %vm461_vm1 = vcmask (!%p1085_p2), 261120  }
  0x4b   : > { %446 = vst [vmem:[#allocation4 + $0x10] sm:$0xff] (!%p1085_p2), %v1394_v14  ;;  %447 = vst [vmem:[#allocation4 + $0x18] sm:$0xff] (!%p1085_p2), %v1394_v14  ;;  %1128 = vmatpush3.bf16.msra.mxu0 (!%p1085_p2), %v452_v15 }
  0x4c   : > { %1129 = vmatprep.subr.bf16.mxu0 (!%p1085_p2), %v1394_v14 }
  0x4f   : > { %1130 = vmatpush3.bf16.msra.mxu0 %v453_v17 }
  0x52   : > { %1132 = vmatmul.mubr.msk.bf16.vlgmr.msra.gmra.mrb[0].mxu0 %vm461_vm1, %v1265_v18 }
 0x125   : > { %v499_v19 = vpop.f32.mrb[0].mxu0 }
 0x126   : > { %v1133_v20 = vpop.f32.mrb[1].mxu0 }
 0x127   : > { %v502_v21 = vpop.f32.mrb[2].mxu0 }
 0x128   : > { %v506_v22 = vpack.c.bf16 %v502_v21, %v499_v19  ;;  %v1134_v23 = vpop.f32.mrb[3].mxu0 }
 0x12a   : > { %507 = vst [vmem:[#allocation5] sm:$0xff] %v506_v22 }
 0x12b PF: > { %v1266_v24 = vld [vmem:[%s398_s16] sm:$0xff]   ;;  %vm537_vm2 = vcmask 130048   ;;  %v1267_v34 = vld [vmem:[%s405_s6] sm:$0xff]   ;;  %v686_v4 = vlaneseq  ;;  %p1099_p3 = scmp.ne.s32.totalorder %s1367_s24, 1 }
 0x12c   : > { %521 = vxpose.xlu0.c.b16.start.end [1/1] (short) %v1266_v24, 128  ;;  %1169 = vmatprep.mubr.bf16.mxu1 %v1267_v34  ;;  %v659_v9 = vld [vmem:[#allocation2] sm:$0x1]  ;;  %s860_s18 = sld [smem:[#allocation6]] (!%p1099_p3) }
 0x12d   : > { %v687_v7 = vshrl.u32 %v686_v4, 7 }
 0x12f   : > { %v1619_v11 = vsub.s32 0, %v687_v7 }
 0x131   : > { %v514_v25 = vld [vmem:[#allocation5] sm:$0xff] }
 0x132   : > { %1135 = vmatprep.subr.bf16.mxu0 %v514_v25 }
 0x133   : > { %1136 = vmatpush3.bf16.msra.mxu0 %v514_v25 }
 0x192   : > { %v529_v26 = vpop.trf.xlu0 }
 0x193   : > { %1137 = vmatprep.mubr.msk.bf16.mxu0 %vm537_vm2, %v529_v26 }
 0x196   : > { %v530_v27 = vpop.trf.xlu0 }
 0x197   : > { %1138 = vmatmul.mubr.msk.bf16.vlgmr.msra.gmra.mrb[0].mxu0 %vm537_vm2, %v530_v27 }
 0x19a   : > { %v531_v28 = vpop.trf.xlu0 }
 0x19b   : > { %1141 = vmatprep.mubr.msk.bf16.mxu0 %vm537_vm2, %v531_v28 }
 0x19e   : > { %v532_v29 = vpop.trf.xlu0 }
 0x19f   : > { %1142 = vmatmul.mubr.msk.bf16.gmra.mrb[4].mxu0 %vm537_vm2, %v532_v29 }
 0x1a2   : > { %v533_v30 = vpop.trf.xlu0 }
 0x1a3   : > { %1145 = vmatprep.mubr.msk.bf16.mxu0 %vm537_vm2, %v533_v30 }
 0x1a6   : > { %v534_v31 = vpop.trf.xlu0 }
 0x1a7   : > { %1146 = vmatmul.mubr.msk.bf16.gmra.mrb[8].mxu0 %vm537_vm2, %v534_v31 }
 0x1aa   : > { %v535_v32 = vpop.trf.xlu0 }
 0x1ab   : > { %1149 = vmatprep.mubr.msk.bf16.mxu0 %vm537_vm2, %v535_v32 }
 0x1ae   : > { %v536_v33 = vpop.trf.xlu0 }
 0x1af   : > { %1150 = vmatmul.mubr.msk.bf16.gmra.mrb[12].mxu0 %vm537_vm2, %v536_v33 }
 0x26a   : > { %v1592_v35 = vpop.f32.mrb[0].mxu0 }
 0x26b   : > { %v596_v36 = vpop.f32.mrb[1].mxu0 }
 0x26c   : > { %v1594_v37 = vpop.f32.mrb[2].mxu0 }
 0x26d   : > { %v599_v38 = vpop.f32.mrb[3].mxu0 }
 0x272   : > { %v1596_v39 = vpop.f32.mrb[4].mxu0 }
 0x273   : > { %v662_v40 = vmax.f32 %v1592_v35, %v1596_v39  ;;  %v612_v41 = vpop.f32.mrb[5].mxu0 }
 0x274   : > { %v660_v42 = vmax.f32 %v596_v36, %v612_v41  ;;  %v1600_v43 = vpop.f32.mrb[6].mxu0 }
 0x275   : > { %v663_v44 = vmax.f32 %v1594_v37, %v1600_v43  ;;  %v615_v45 = vpop.f32.mrb[7].mxu0 }
 0x276   : > { %v661_v46 = vmax.f32 %v599_v38, %v615_v45 }
 0x27a   : > { %v1604_v47 = vpop.f32.mrb[8].mxu0 }
 0x27b   : > { %v666_v48 = vmax.f32 %v662_v40, %v1604_v47  ;;  %v628_v49 = vpop.f32.mrb[9].mxu0 }
 0x27c   : > { %v664_v50 = vmax.f32 %v660_v42, %v628_v49  ;;  %v1607_v51 = vpop.f32.mrb[10].mxu0 }
 0x27d   : > { %v667_v52 = vmax.f32 %v663_v44, %v1607_v51  ;;  %v631_v53 = vpop.f32.mrb[11].mxu0 }
 0x27e   : > { %v665_v54 = vmax.f32 %v661_v46, %v631_v53 }
 0x282   : > { %v1610_v55 = vpop.f32.mrb[12].mxu0 }
 0x283   : > { %v670_v56 = vmax.f32 %v666_v48, %v1610_v55  ;;  %v1613_v57 = vpop.f32.mrb[13].mxu0 }
 0x284   : > { %v668_v58 = vmax.f32 %v664_v50, %v1613_v57  ;;  %v1616_v59 = vpop.f32.mrb[14].mxu0 }
 0x285   : > { %v671_v60 = vmax.f32 %v667_v52, %v1616_v59  ;;  %v647_v61 = vpop.f32.mrb[15].mxu0 }
 0x286   : > { %v669_v62 = vmax.f32 %v665_v54, %v647_v61 }
 0x287   : > { %v673_v63 = vmax.f32 %v670_v56, %v671_v60 }
 0x288   : > { %v672_v0 = vmax.f32 %v668_v58, %v669_v62 }
 0x28a   : > { %v674_v1 = vmax.f32 %v672_v0, %v673_v63 }
 0x28c   : > { %v675_v2 = vrot.slane %v674_v1, 4 }
 0x28e   : > { %v676_v3 = vmax.f32 %v674_v1, %v675_v2 }
 0x290   : > { %v677_v5 = vrot.slane %v676_v3, 2 }
 0x292   : > { %v678_v6 = vmax.f32 %v676_v3, %v677_v5 }
 0x294   : > { %v679_v8 = vrot.slane %v678_v6, 1 }
 0x296   : > { %v680_v10 = vmax.f32 %v678_v6, %v679_v8 }
 0x298   : > { %v681_v12 = vmax.f32 %v659_v9, %v680_v10 }
 0x29a   : > { %v682_v13 = vsub.f32 %v659_v9, %v681_v12  ;;  %v689_v14 = vrot.slane %v681_v12, %v1619_v11  ;;  %855 = vst [vmem:[#allocation2] sm:$0x1] %v681_v12 }
 0x29c   : > { %v683_v15 = vmul.f32 1.442695, %v682_v13  ;;  %v691_v16 = vsub.f32 %v596_v36, %v689_v14  ;;  %v692_v17 = vsub.f32 %v599_v38, %v689_v14  ;;  %v693_v18 = vsub.f32 %v1592_v35, %v689_v14 }
 0x29d   : > { %v694_v19 = vsub.f32 %v1594_v37, %v689_v14  ;;  %v695_v20 = vsub.f32 %v612_v41, %v689_v14  ;;  %v696_v21 = vsub.f32 %v615_v45, %v689_v14  ;;  %v697_v22 = vsub.f32 %v1596_v39, %v689_v14 }
 0x29e   : > { %1269 = vpow2.f32 %v683_v15  ;;  %v698_v23 = vsub.f32 %v1600_v43, %v689_v14  ;;  %v699_v24 = vsub.f32 %v628_v49, %v689_v14  ;;  %v700_v25 = vsub.f32 %v631_v53, %v689_v14 }
 0x29f   : > { %v701_v26 = vsub.f32 %v1604_v47, %v689_v14  ;;  %v702_v27 = vsub.f32 %v1607_v51, %v689_v14  ;;  %v703_v28 = vsub.f32 %v1613_v57, %v689_v14  ;;  %v704_v29 = vsub.f32 %v647_v61, %v689_v14 }
 0x2a0   : > { %v705_v30 = vsub.f32 %v1610_v55, %v689_v14  ;;  %v707_v31 = vmul.f32 1.442695, %v691_v16  ;;  %v709_v32 = vmul.f32 1.442695, %v692_v17  ;;  %v711_v33 = vmul.f32 1.442695, %v693_v18 }
 0x2a1   : > { %v713_v34 = vmul.f32 1.442695, %v694_v19  ;;  %v706_v35 = vsub.f32 %v1616_v59, %v689_v14  ;;  %v715_v36 = vmul.f32 1.442695, %v695_v20  ;;  %v717_v37 = vmul.f32 1.442695, %v696_v21 }
 0x2a2   : > { %1271 = vpow2.f32 %v707_v31  ;;  %v719_v38 = vmul.f32 1.442695, %v697_v22  ;;  %v721_v39 = vmul.f32 1.442695, %v698_v23  ;;  %v723_v40 = vmul.f32 1.442695, %v699_v24 }
 0x2a3   : > { %1273 = vpow2.f32 %v709_v32  ;;  %v725_v41 = vmul.f32 1.442695, %v700_v25  ;;  %v727_v43 = vmul.f32 1.442695, %v701_v26  ;;  %v729_v44 = vmul.f32 1.442695, %v702_v27 }
 0x2a4   : > { %1275 = vpow2.f32 %v711_v33  ;;  %v731_v46 = vmul.f32 1.442695, %v703_v28  ;;  %v733_v47 = vmul.f32 1.442695, %v704_v29  ;;  %v735_v49 = vmul.f32 1.442695, %v705_v30 }
 0x2a5   : > { %1277 = vpow2.f32 %v713_v34  ;;  %v737_v51 = vmul.f32 1.442695, %v706_v35  ;;  %v1268_v27 = vld [vmem:[%s405_s6 + $0x8] sm:$0xff]   ;;  %v739_v31 = vld [vmem:[#allocation3] sm:$0x1] }
 0x2a6   : > { %1279 = vpow2.f32 %v715_v36  ;;  %v774_v36 = vld [vmem:[#allocation4 + $0x10] sm:$0xff] }
 0x2a7   : > { %1281 = vpow2.f32 %v717_v37  ;;  %v772_v37 = vld [vmem:[#allocation4] sm:$0xff] }
 0x2a8   : > { %v1631_v42 = vpop.eup %1269  ;;  %1283 = vpow2.f32 %v719_v38  ;;  %v775_v38 = vld [vmem:[#allocation4 + $0x18] sm:$0xff] }
 0x2a9   : > { %1285 = vpow2.f32 %v721_v39  ;;  %v1635_v45 = vrot.slane %v1631_v42, %v1619_v11  ;;  %v740_v33 = vmul.f32 %v1631_v42, %v739_v31 }
 0x2aa   : > { %1287 = vpow2.f32 %v723_v40  ;;  %v773_v40 = vld [vmem:[#allocation4 + $0x8] sm:$0xff] }
 0x2ab   : > { %1289 = vpow2.f32 %v725_v41  ;;  %v784_v39 = vmul.f32 %v1635_v45, %v774_v36  ;;  %v783_v42 = vmul.f32 %v1635_v45, %v773_v40 }
 0x2ac   : > { %v1272_v48 = vpop.eup %1271  ;;  %1291 = vpow2.f32 %v727_v43  ;;  %v782_v43 = vmul.f32 %v1635_v45, %v772_v37 }
 0x2ad   : > { %v1274_v50 = vpop.eup %1273  ;;  %1293 = vpow2.f32 %v729_v44 }
 0x2ae   : > { %v1276_v52 = vpop.eup %1275  ;;  %1295 = vpow2.f32 %v731_v46  ;;  %v741_v53 = vadd.f32 %v1274_v50, %v1272_v48  ;;  %v764_v54 = vpack.c.bf16 %v1274_v50, %v1272_v48 }
 0x2af   : > { %v1278_v55 = vpop.eup %1277  ;;  %1297 = vpow2.f32 %v733_v47  ;;  %v785_v47 = vmul.f32 %v1635_v45, %v775_v38 }
 0x2b0   : > { %v1280_v56 = vpop.eup %1279  ;;  %1299 = vpow2.f32 %v735_v49  ;;  %v742_v57 = vadd.f32 %v1276_v52, %v741_v53  ;;  %1153 = vmatprep.subr.bf16.mxu1 %v764_v54  ;;  %v765_v58 = vpack.c.bf16 %v1278_v55, %v1276_v52 }
 0x2b1   : > { %v1282_v59 = vpop.eup %1281  ;;  %1154 = vmatpush3.bf16.msra.mxu1 %v764_v54  ;;  %1301 = vpow2.f32 %v737_v51 }
 0x2b2   : > { %v1284_v60 = vpop.eup %1283  ;;  %v743_v61 = vadd.f32 %v1278_v55, %v742_v57  ;;  %1155 = vmatprep.subr.bf16.mxu1 %v765_v58  ;;  %v766_v62 = vpack.c.bf16 %v1282_v59, %v1280_v56 }
 0x2b3   : > { %v1286_v63 = vpop.eup %1285 }
 0x2b4   : > { %v1288_v0 = vpop.eup %1287  ;;  %v744_v1 = vadd.f32 %v1280_v56, %v743_v61  ;;  %v767_v2 = vpack.c.bf16 %v1286_v63, %v1284_v60  ;;  %v882_v61 = vld [vmem:[%s1566_s13] sm:$0xff] (!%p1099_p3) }
 0x2b5   : > { %v1290_v3 = vpop.eup %1289  ;;  %1156 = vmatpush3.bf16.msra.mxu1 %v765_v58 }
 0x2b6   : > { %v1292_v4 = vpop.eup %1291  ;;  %v745_v5 = vadd.f32 %v1282_v59, %v744_v1  ;;  %1157 = vmatprep.subr.bf16.mxu1 %v766_v62  ;;  %v768_v6 = vpack.c.bf16 %v1290_v3, %v1288_v0  ;;  %v877_v59 = vstv (!%p1099_p3), %s860_s18  ;;  %v883_v1 = vld [vmem:[%s1566_s13 + $0x8] sm:$0xff] (!%p1099_p3) }
 0x2b7   : > { %v1294_v7 = vpop.eup %1293 }
 0x2b8   : > { %v1296_v8 = vpop.eup %1295  ;;  %v746_v9 = vadd.f32 %v1284_v60, %v745_v5  ;;  %v769_v10 = vpack.c.bf16 %v1294_v7, %v1292_v4 }
 0x2b9   : > { %v1298_v12 = vpop.eup %1297  ;;  %1158 = vmatpush3.bf16.msra.mxu1 %v766_v62 }
 0x2ba   : > { %v1300_v13 = vpop.eup %1299  ;;  %v747_v14 = vadd.f32 %v1286_v63, %v746_v9  ;;  %1159 = vmatprep.subr.bf16.mxu1 %v767_v2  ;;  %v770_v15 = vpack.c.bf16 %v1298_v12, %v1296_v8 }
 0x2bb   : > { %v1302_v16 = vpop.eup %1301 }
 0x2bc   : > { %v748_v17 = vadd.f32 %v1288_v0, %v747_v14  ;;  %v771_v18 = vpack.c.bf16 %v1302_v16, %v1300_v13 }
 0x2bd   : > { %1160 = vmatpush3.bf16.msra.mxu1 %v767_v2  ;;  %v884_v2 = vld [vmem:[%s1566_s13 + $0x10] sm:$0xff] (!%p1099_p3) }
 0x2be   : > { %v749_v19 = vadd.f32 %v1290_v3, %v748_v17  ;;  %1161 = vmatprep.subr.bf16.mxu1 %v768_v6  ;;  %v885_v3 = vld [vmem:[%s1566_s13 + $0x18] sm:$0xff] (!%p1099_p3) }
 0x2c0   : > { %v750_v20 = vadd.f32 %v1292_v4, %v749_v19 }
 0x2c1   : > { %1162 = vmatpush3.bf16.msra.mxu1 %v768_v6 }
 0x2c2   : > { %v751_v21 = vadd.f32 %v1294_v7, %v750_v20  ;;  %1163 = vmatprep.subr.bf16.mxu1 %v769_v10 }
 0x2c4   : > { %v752_v22 = vadd.f32 %v1296_v8, %v751_v21 }
 0x2c5   : > { %1164 = vmatpush3.bf16.msra.mxu1 %v769_v10 }
 0x2c6   : > { %v753_v23 = vadd.f32 %v1298_v12, %v752_v22  ;;  %1165 = vmatprep.subr.bf16.mxu1 %v770_v15 }
 0x2c8   : > { %v754_v24 = vadd.f32 %v1300_v13, %v753_v23 }
 0x2c9   : > { %1166 = vmatpush3.bf16.msra.mxu1 %v770_v15 }
 0x2ca   : > { %v755_v25 = vadd.f32 %v1302_v16, %v754_v24  ;;  %1167 = vmatprep.subr.bf16.mxu1 %v771_v18 }
 0x2cc   : > { %v756_v26 = vrot.slane %v755_v25, 4 }
 0x2cd   : > { %1168 = vmatpush3.bf16.msra.mxu1 %v771_v18 }
 0x2ce   : > { %v757_v28 = vadd.f32 %v756_v26, %v755_v25 }
 0x2d0   : > { %v758_v29 = vrot.slane %v757_v28, 2  ;;  %1170 = vmatmul.mubr.bf16.vlgmr.msra.gmra.mrb[0].mxu1 %v1268_v27 }
 0x2d2   : > { %v759_v30 = vadd.f32 %v758_v29, %v757_v28 }
 0x2d4   : > { %v760_v32 = vrot.slane %v759_v30, 1 }
 0x2d6   : > { %v761_v34 = vadd.f32 %v760_v32, %v759_v30 }
 0x2d8   : > { %v762_v35 = vadd.f32 %v761_v34, %v740_v33 }
 0x2da   : > { %763 = vst [vmem:[#allocation3] sm:$0x1] %v762_v35 }
 0x2e1   : > { %v861_v53 = vld [vmem:[#allocation3] sm:$0x1] (!%p1099_p3) }
 0x2e2   : > { %1303 = vrcp.f32 (!%p1099_p3), %v861_v53 }
 0x2ec   : > { %v1304_v55 = vpop.eup (!%p1099_p3), %1303 }
 0x2ed   : > { %v871_v58 = vrot.slane (!%p1099_p3), %v1304_v55, %v1619_v11 }
 0x3a3   : > { %v1171_v41 = vpop.f32.mrb[0].mxu1  ;;  %859 = sbr.rel (%p1099_p3) target bundleno = 952 (0x3b8), region = 168 }
 0x3a4   : > { %v849_v44 = vadd.f32 %v1171_v41, %v784_v39  ;;  %v832_v46 = vpop.f32.mrb[1].mxu1 }
 0x3a5   : > { %v847_v48 = vadd.f32 %v832_v46, %v782_v43  ;;  %v1172_v49 = vpop.f32.mrb[2].mxu1 }
 0x3a6   : > { %853 = vst [vmem:[#allocation4 + $0x10] sm:$0xff] %v849_v44  ;;  %v850_v50 = vadd.f32 %v1172_v49, %v785_v47  ;;  %v835_v51 = vpop.f32.mrb[3].mxu1 }
 0x3a7   : > { %851 = vst [vmem:[#allocation4] sm:$0xff] %v847_v48  ;;  %v848_v52 = vadd.f32 %v835_v51, %v783_v42 }
 0x3a8   : > { %854 = vst [vmem:[#allocation4 + $0x18] sm:$0xff] %v850_v50 }
 0x3a9   : > { %852 = vst [vmem:[#allocation4 + $0x8] sm:$0xff] %v848_v52 }
 0x3ad   : > { %v865_v56 = vld [vmem:[#allocation4 + $0x10] sm:$0xff] }
 0x3ae   : > { %v863_v54 = vld [vmem:[#allocation4] sm:$0xff]  ;;  %v875_v63 = vmul.f32 %v871_v58, %v865_v56 }
 0x3af   : > { %v866_v57 = vld [vmem:[#allocation4 + $0x18] sm:$0xff]  ;;  %v873_v60 = vmul.f32 %v871_v58, %v863_v54 }
 0x3b0   : > { %v864_v45 = vld [vmem:[#allocation4 + $0x8] sm:$0xff]  ;;  %v876_v0 = vmul.f32 %v871_v58, %v866_v57  ;;  %v880_v6 = vmul.f32 %v877_v59, %v875_v63 }
 0x3b1   : > { %v874_v62 = vmul.f32 %v871_v58, %v864_v45  ;;  %v878_v4 = vmul.f32 %v877_v59, %v873_v60 }
 0x3b2   : > { %v881_v7 = vmul.f32 %v877_v59, %v876_v0  ;;  %v888_v11 = vadd.f32 %v884_v2, %v880_v6 }
 0x3b3   : > { %v879_v5 = vmul.f32 %v877_v59, %v874_v62  ;;  %v886_v8 = vadd.f32 %v882_v61, %v878_v4 }
 0x3b4   : > { %v889_v10 = vadd.f32 %v885_v3, %v881_v7  ;;  %892 = vst [vmem:[%s1570_s7 + $0x10] sm:$0xff] %v888_v11 }
 0x3b5   : > { %v887_v9 = vadd.f32 %v883_v1, %v879_v5  ;;  %890 = vst [vmem:[%s1570_s7] sm:$0xff] %v886_v8 }
 0x3b6   : > { %893 = vst [vmem:[%s1570_s7 + $0x18] sm:$0xff] %v889_v10 }
 0x3b7   : > { %891 = vst [vmem:[%s1570_s7 + $0x8] sm:$0xff] %v887_v9 }
 0x3b8 PF: > { %900 = sbr.rel (!%p1520_p9) target bundleno = 960 (0x3c0), region = 172  ;;  %s1101_s24 = sshll.u32 (%p1520_p9), %s1375_s26, 3 }
 0x3b9   : > { %s902_s10 = sadd.s32 (%p1520_p9), %s1371_s25, %s1101_s24 }
 0x3ba   : > { %s1102_s11 = sshll.u32 (%p1520_p9), %s902_s10, 3 }
 0x3bb   : > { %v942_v14 = vld [vmem:[%s1570_s7 + $0x10] sm:$0xff] (%p1520_p9)  ;;  %s904_s12 = scalar_lea.vmem (%p1520_p9), %s1703_s5, %s1102_s11 }
 0x3bc   : > { %v938_v12 = vld [vmem:[%s1570_s7] sm:$0xff] (%p1520_p9)  ;;  %943 = vst [vmem:[%s904_s12 + $0x20] sm:$0xff] (%p1520_p9), %v942_v14 }
 0x3bd   : > { %v944_v15 = vld [vmem:[%s1570_s7 + $0x18] sm:$0xff] (%p1520_p9)  ;;  %939 = vst [vmem:[%s904_s12] sm:$0xff] (%p1520_p9), %v938_v12 }
 0x3be   : > { %v940_v13 = vld [vmem:[%s1570_s7 + $0x8] sm:$0xff] (%p1520_p9)  ;;  %945 = vst [vmem:[%s904_s12 + $0x30] sm:$0xff] (%p1520_p9), %v944_v15 }
 0x3bf   : > { %941 = vst [vmem:[%s904_s12 + $0x10] sm:$0xff] %v940_v13 }
 0x3c0 PF: > { %s16_s4 = sadd.s32 1, %s1391_s4   ;;  %s1715_s14 = sld [smem:[#allocation11_spill]] }
 0x3c1   : > { %p13_p4 = scmp.ge.s32.totalorder %s16_s4, 10   ;;  %s1716_s15 = sld [smem:[#allocation12_spill]] }
 0x3c2   : > { %s1717_s30 = sld [smem:[#allocation13_spill]]  ;;  %s1718_s20 = smov %s1355_s21 }
 0x3c3   : > { %s1719_s21 = smov %s1531_s8  ;;  %s1720_s22 = smov %s1363_s23 }
 0x3c4   : > { %s1721_s23 = smov %s1528_s19  ;;  %s1722_s24 = smov %s1379_s27 }
 0x3c5   : > { %s1723_s25 = smov %s1383_s28  ;;  %s1724_s26 = smov %s1387_s29 }
 0x3c6   : > { %s1725_s27 = smov %s1715_s14  ;;  %15 = sbr.rel (!%p13_p4) target bundleno = 9 (0x9), region = 257 }
 0x3c7   : > { %s1726_s28 = smov %s1716_s15 }
 0x3c8   : > { %s1727_s29 = smov %s1717_s30 }

</bundles_post_ra>
